<compile_context>
chip_gen: v6e
topology: v6e:2x2x1
jax: 0.10.0
libtpu: 0.0.40
codegen_flags: <defaults>
</compile_context>

<pallas_src>
import math

import numpy as np
import jax
import jax.numpy as jnp
from jax.experimental import pallas as pl
from jax.experimental.pallas import tpu as pltpu

_LANE = 128
_SUBLANE = 8
_TARGET_TILE_BYTES = 4 * 1024 * 1024      # ~4 MiB per block (copy is BW bound)
_VMEM_LIMIT_BYTES = 32 * 1024 * 1024      # safe scoped budget on v5e/v6e/v7x


def _copy_kernel(x_ref, o_ref):
    # Identity: stream the current lane-dense tile through VMEM unchanged.
    o_ref[...] = x_ref[...]


def _tiled_identity_2d(flat: jax.Array) -> jax.Array:
    """Identity copy of a 2D array, tiled over rows with lane-dense blocks."""
    rows, cols = flat.shape
    itemsize = jnp.dtype(flat.dtype).itemsize

    # Pick a row-block so one tile is ~_TARGET_TILE_BYTES.
    max_rows = max(1, _TARGET_TILE_BYTES // (cols * itemsize))
    if rows <= max_rows:
        block_rows = rows                                   # full dim -> legal tile
    else:
        block_rows = max(_SUBLANE, (max_rows // _SUBLANE) * _SUBLANE)

    grid = (pl.cdiv(rows, block_rows),)

    return pl.pallas_call(
        _copy_kernel,
        out_shape=jax.ShapeDtypeStruct((rows, cols), flat.dtype),
        grid=grid,
        in_specs=[pl.BlockSpec((block_rows, cols), lambda i: (i, 0))],
        out_specs=pl.BlockSpec((block_rows, cols), lambda i: (i, 0)),
        # Identity: let the output alias the input buffer.  With a donated
        # input this removes the extra output allocation entirely.
        input_output_aliases={0: 0},
        compiler_params=pltpu.CompilerParams(
            dimension_semantics=("parallel",),
            vmem_limit_bytes=_VMEM_LIMIT_BYTES,
        ),
    )(flat)


def attention_map(att: jax.Array) -> jax.Array:
    """Pallas implementation of AttentionMap.forward: returns `att` unchanged."""
    shape = att.shape
    n = math.prod(shape) if shape else 1

    # Flatten to a lane-dense 2D layout: cols is a large multiple of 128 so
    # stores are unmasked full-width `vst`s and DMAs run at full burst width.
    cols = None
    for cand in (32768, 16384, 8192, 4096, 2048, 1024, 512, 256, 128):
        if n % cand == 0:
            cols = cand
            break

    if cols is not None:
        flat = att.reshape(n // cols, cols)
    else:
        # TODO(synk): total size not a multiple of 128 -> lane-sparse fallback
        # (padding in the wrapper would add an extra HBM pass for no gain).
        last = shape[-1] if len(shape) >= 1 else 1
        flat = att.reshape(max(1, n // max(1, last)), max(1, last))

    out = _tiled_identity_2d(flat)
    return out.reshape(shape)


if __name__ == "__main__":
    key = jax.random.PRNGKey(0)
    # Attention-map-like input: (batch=2, heads=4, seq=16, seq=16)
    att = jax.random.normal(key, (2, 4, 16, 16), dtype=jnp.float32)
    att_host = np.asarray(att)  # host reference; `att` is donated below

    # Donate the input so input_output_aliases avoids a defensive copy.
    fwd = jax.jit(attention_map, donate_argnums=(0,))
    out = jax.block_until_ready(fwd(att))

    assert out.shape == att_host.shape
    assert out.dtype == jnp.float32
    np.testing.assert_array_equal(np.asarray(out), att_host)

    print("KERNEL_OK")
</pallas_src>

<mosaic_0001>
module attributes {stable_mosaic.version = 11 : i64} {
  func.func @_copy_kernel(%arg0: i32, %arg1: memref<1x2048xf32, #tpu.memory_space<vmem>>, %arg2: memref<1x2048xf32, #tpu.memory_space<vmem>>) attributes {dimension_semantics = [#tpu.dimension_semantics<parallel>], iteration_bounds = array<i64: 1>, scalar_prefetch = 0 : i64, scratch_operands = 0 : i64, tpu.core_type = #tpu.core_type<tc>, window_params = [{transform_indices = @transform_0, window_bounds = array<i64: 1, 2048>}, {transform_indices = @transform_1, window_bounds = array<i64: 1, 2048>}]} {
    %c0 = arith.constant 0 : index
    %c0_0 = arith.constant 0 : index
    %0 = vector.load %arg1[%c0, %c0_0] : memref<1x2048xf32, #tpu.memory_space<vmem>>, vector<1x2048xf32>
    %c0_1 = arith.constant 0 : index
    %c0_2 = arith.constant 0 : index
    %1 = vector.load %arg2[%c0_1, %c0_2] : memref<1x2048xf32, #tpu.memory_space<vmem>>, vector<1x2048xf32>
    tpu.vector_store %arg2[%c0_1, %c0_2], %0 {strides = array<i32>} : memref<1x2048xf32, #tpu.memory_space<vmem>>, vector<1x2048xf32>,
    return
  }
  func.func @transform_0(%arg0: i32) -> (i32, i32) {
    %c0_i32 = arith.constant 0 : i32
    %c0_i32_0 = arith.constant 0 : i32
    return %arg0, %c0_i32 : i32, i32
  }
  func.func @transform_1(%arg0: i32) -> (i32, i32) {
    %c0_i32 = arith.constant 0 : i32
    %c0_i32_0 = arith.constant 0 : i32
    return %arg0, %c0_i32 : i32, i32
  }
}

</mosaic_0001>

<bundles_post_ra>
// kernel: attention_map.1
= control target key start
LH: loop header
LB: loop body
LE: loop exit
PB: predicated region body
PF: predicated region fallthrough
CT: control target
= control target key end

     0   :  { %s38_s0 = inlined_call_operand.vmem [shape: f32[1,2048], index: 0, kind: input, shape index: {}, may-alias: {0,1}]   ;;  %s39_s1 = inlined_call_operand.vmem [shape: f32[1,2048], index: 1, kind: output, shape index: {}, may-alias: {0,1}]  }
   0x1   :  { %v8_v0 = vld [vmem:[%s38_s0] sm:$0xff]  ;;  %v9_v1 = vld [vmem:[%s38_s0 + $0x8] sm:$0xff] }
   0x2   :  { %10 = vst [vmem:[%s39_s1] sm:$0xff] %v8_v0  ;;  %11 = vst [vmem:[%s39_s1 + $0x8] sm:$0xff] %v9_v1 }

</bundles_post_ra>
